<compile_context>
chip_gen: v7x
topology: tpu7x:2x2x1
jax: 0.10.0
libtpu: 0.0.40
codegen_flags: <defaults>
</compile_context>

<pallas_src>
import math
import functools

import jax
import jax.numpy as jnp
from jax.experimental import pallas as pl
from jax.experimental.pallas import tpu as pltpu


def _round_up(a: int, b: int) -> int:
    return (a + b - 1) // b * b


def _fc_kernel(*refs, weight_gain, bias_gain, use_bias, activation,
               activation_gain):
    if use_bias:
        x_ref, w_ref, b_ref, o_ref, acc_ref = refs
    else:
        x_ref, w_ref, o_ref, acc_ref = refs
        b_ref = None

    k = pl.program_id(2)

    @pl.when(k == 0)
    def _init():
        acc_ref[...] = jnp.zeros_like(acc_ref)

    # Native-dtype matmul on the MXU, f32 accumulation (NN layout: (tm,tk)x(tk,tn)).
    acc_ref[...] += jnp.dot(x_ref[...], w_ref[...],
                            preferred_element_type=jnp.float32)

    @pl.when(k == pl.num_programs(2) - 1)
    def _finalize():
        # Equalized-LR scale applied to the small (tm, tn) accumulator,
        # *before* the bias add (bias only carries lr_multiplier).
        out = acc_ref[...] * weight_gain
        if b_ref is not None:
            b = b_ref[...].astype(jnp.float32)
            if bias_gain != 1.0:
                b = b * bias_gain
            out = out + b  # (1, tn) broadcasts over rows
        if activation == "lrelu":
            out = jnp.where(out >= 0.0, out, 0.2 * out) * activation_gain
        elif activation == "relu":
            out = jnp.maximum(out, 0.0) * activation_gain
        elif activation is not None:
            raise NotImplementedError(f"activation {activation!r}")
            # TODO(synk): other Activation.make(...) variants not reproduced.
        o_ref[...] = out.astype(o_ref.dtype)


def fully_connected(x, weight, bias=None, *, lr_multiplier=1.0,
                    activation=None, activation_gain=math.sqrt(2.0),
                    tile_m=256, tile_n=256, tile_k=512):
    """Pallas implementation of FullyConnected.forward."""
    B, in_dim = x.shape
    out_dim, in_dim_w = weight.shape
    assert in_dim == in_dim_w

    weight_gain = float(lr_multiplier) / math.sqrt(in_dim)
    bias_gain = float(lr_multiplier)
    use_bias = bias is not None

    # --- choose tiles & padded extents (lane-dense, (8,128)-aligned) ---------
    if B <= tile_m:
        tm = _round_up(max(B, 1), 8)
        m_pad = tm
    else:
        tm = tile_m
        m_pad = _round_up(B, tm)

    if in_dim <= tile_k:
        tk = _round_up(in_dim, 128)
        k_pad = tk
    else:
        tk = tile_k
        k_pad = _round_up(in_dim, tk)

    if out_dim <= tile_n:
        tn = _round_up(out_dim, 128)
        n_pad = tn
    else:
        tn = tile_n
        n_pad = _round_up(out_dim, tn)

    # --- one-time layout work in the wrapper (amortized over the grid) ------
    # NN layout: (in_dim, out_dim), cast to the activation dtype for the MXU.
    w_t = jnp.asarray(weight, x.dtype).T
    if w_t.shape != (k_pad, n_pad):
        w_t = jnp.pad(w_t, ((0, k_pad - in_dim), (0, n_pad - out_dim)))

    x_p = x
    if x_p.shape != (m_pad, k_pad):
        x_p = jnp.pad(x_p, ((0, m_pad - B), (0, k_pad - in_dim)))

    args = [x_p, w_t]
    in_specs = [
        pl.BlockSpec((tm, tk), lambda i, j, k: (i, k)),   # x tile
        pl.BlockSpec((tk, tn), lambda i, j, k: (k, j)),   # weight tile (NN)
    ]
    if use_bias:
        b2 = jnp.asarray(bias, jnp.float32).reshape(1, out_dim)
        if n_pad != out_dim:
            b2 = jnp.pad(b2, ((0, 0), (0, n_pad - out_dim)))
        args.append(b2)
        in_specs.append(pl.BlockSpec((1, tn), lambda i, j, k: (0, j)))

    grid = (m_pad // tm, n_pad // tn, k_pad // tk)

    kernel = functools.partial(
        _fc_kernel,
        weight_gain=weight_gain,
        bias_gain=bias_gain,
        use_bias=use_bias,
        activation=activation,
        activation_gain=activation_gain,
    )

    itemsize = jnp.dtype(x.dtype).itemsize
    cost = pl.CostEstimate(
        flops=2 * m_pad * n_pad * k_pad,
        transcendentals=0,
        bytes_accessed=(m_pad * k_pad * itemsize
                        + k_pad * n_pad * itemsize
                        + m_pad * n_pad * itemsize),
    )

    out = pl.pallas_call(
        kernel,
        out_shape=jax.ShapeDtypeStruct((m_pad, n_pad), x.dtype),
        grid_spec=pltpu.PrefetchScalarGridSpec(
            num_scalar_prefetch=0,
            grid=grid,
            in_specs=in_specs,
            out_specs=pl.BlockSpec((tm, tn), lambda i, j, k: (i, j)),
            scratch_shapes=[pltpu.VMEM((tm, tn), jnp.float32)],
        ),
        compiler_params=pltpu.CompilerParams(
            dimension_semantics=("parallel", "parallel", "arbitrary"),
            vmem_limit_bytes=32 * 1024 * 1024,
        ),
        cost_estimate=cost,
    )(*args)

    if (m_pad, n_pad) != (B, out_dim):
        out = out[:B, :out_dim]
    return out


def _reference(x, weight, bias, lr_multiplier, activation, activation_gain):
    w = weight * (lr_multiplier / math.sqrt(weight.shape[1]))
    out = x @ w.T
    if bias is not None:
        out = out + bias * lr_multiplier
    if activation == "lrelu":
        out = jnp.where(out >= 0.0, out, 0.2 * out) * activation_gain
    elif activation == "relu":
        out = jnp.maximum(out, 0.0) * activation_gain
    return out


if __name__ == "__main__":
    key = jax.random.PRNGKey(0)
    k_w, k_x = jax.random.split(key)

    batch, in_dim, out_dim = 8, 32, 64
    lr_multiplier = 0.01          # typical StyleGAN2 mapping-network value
    bias_init = 0.0
    activation = "lrelu"
    activation_gain = math.sqrt(2.0)

    # parameter init mirrors the PyTorch __init__:
    #   weight = randn(out_dim, in_dim) / lr_multiplier ; bias = full(bias_init)
    weight = jax.random.normal(k_w, (out_dim, in_dim), jnp.float32) / lr_multiplier
    bias = jnp.full((out_dim,), bias_init, jnp.float32)
    x = jax.random.normal(k_x, (batch, in_dim), jnp.float32)

    # with activation + bias (mapping-network style)
    out = fully_connected(
        x, weight, bias,
        lr_multiplier=lr_multiplier,
        activation=activation,
        activation_gain=activation_gain,
    )
    out = jax.block_until_ready(out)
    ref = _reference(x, weight, bias, lr_multiplier, activation, activation_gain)
    assert out.shape == ref.shape
    assert jnp.allclose(out, ref, atol=1e-4, rtol=1e-4), "mismatch (lrelu path)"

    # plain linear path (activation=None, no bias), default lr_multiplier
    out2 = fully_connected(x, weight, None, lr_multiplier=1.0, activation=None)
    out2 = jax.block_until_ready(out2)
    ref2 = _reference(x, weight, None, 1.0, None, 1.0)
    assert jnp.allclose(out2, ref2, atol=1e-4, rtol=1e-4), "mismatch (no-bias path)"

    # odd batch size (exercises the pad/slice path instead of the old assert)
    x3 = jax.random.normal(k_x, (5, in_dim), jnp.float32)
    out3 = jax.block_until_ready(
        fully_connected(x3, weight, bias, lr_multiplier=lr_multiplier,
                        activation=activation, activation_gain=activation_gain))
    ref3 = _reference(x3, weight, bias, lr_multiplier, activation, activation_gain)
    assert jnp.allclose(out3, ref3, atol=1e-4, rtol=1e-4), "mismatch (odd batch)"

    print("KERNEL_OK")
</pallas_src>

<mosaic_0001>
module attributes {stable_mosaic.version = 11 : i64} {
  func.func @_fc_kernel(%arg0: i32, %arg1: i32, %arg2: i32, %arg3: memref<8x128xf32, #tpu.memory_space<vmem>>, %arg4: memref<128x128xf32, #tpu.memory_space<vmem>>, %arg5: memref<1x128xf32, #tpu.memory_space<vmem>>, %arg6: memref<8x128xf32, #tpu.memory_space<vmem>>, %arg7: memref<8x128xf32, #tpu.memory_space<vmem>>) attributes {dimension_semantics = [#tpu.dimension_semantics<parallel>, #tpu.dimension_semantics<parallel>, #tpu.dimension_semantics<arbitrary>], iteration_bounds = array<i64: 1, 1, 1>, scalar_prefetch = 0 : i64, scratch_operands = 1 : i64, tpu.core_type = #tpu.core_type<tc>, window_params = [{transform_indices = @transform_0, window_bounds = array<i64: 8, 128>}, {transform_indices = @transform_1, window_bounds = array<i64: 128, 128>}, {transform_indices = @transform_2, window_bounds = array<i64: 1, 128>}, {transform_indices = @transform_3, window_bounds = array<i64: 8, 128>}]} {
    %c0_i32 = arith.constant 0 : i32
    %0 = arith.cmpi eq, %arg2, %c0_i32 : i32
    %1 = arith.extui %0 : i1 to i32
    %c0_i32_0 = arith.constant 0 : i32
    %2 = arith.cmpi ne, %1, %c0_i32_0 : i32
    scf.if %2 {
      %cst_10 = arith.constant 0.000000e+00 : f32
      %12 = vector.broadcast %cst_10 : f32 to vector<8x128xf32>
      %c0_11 = arith.constant 0 : index
      %c0_12 = arith.constant 0 : index
      %13 = vector.load %arg7[%c0_11, %c0_12] : memref<8x128xf32, #tpu.memory_space<vmem>>, vector<8x128xf32>
      tpu.vector_store %arg7[%c0_11, %c0_12], %12 {strides = array<i32>} : memref<8x128xf32, #tpu.memory_space<vmem>>, vector<8x128xf32>,
    } else {
    }
    %c0 = arith.constant 0 : index
    %c0_1 = arith.constant 0 : index
    %3 = vector.load %arg7[%c0, %c0_1] : memref<8x128xf32, #tpu.memory_space<vmem>>, vector<8x128xf32>
    %c0_2 = arith.constant 0 : index
    %c0_3 = arith.constant 0 : index
    %4 = vector.load %arg3[%c0_2, %c0_3] : memref<8x128xf32, #tpu.memory_space<vmem>>, vector<8x128xf32>
    %c0_4 = arith.constant 0 : index
    %c0_5 = arith.constant 0 : index
    %5 = vector.load %arg4[%c0_4, %c0_5] : memref<128x128xf32, #tpu.memory_space<vmem>>, vector<128x128xf32>
    %cst = arith.constant dense<0.000000e+00> : vector<8x128xf32>
    %6 = tpu.matmul %4, %5, %cst {dimension_numbers = #tpu.dot_dimension_numbers<[1], [0], [0], [1], [0, 0, 1, 1], [], []>} : vector<8x128xf32>, vector<128x128xf32>, vector<8x128xf32> -> vector<8x128xf32>
    %7 = arith.addf %3, %6 : vector<8x128xf32>
    %c0_6 = arith.constant 0 : index
    %c0_7 = arith.constant 0 : index
    %8 = vector.load %arg7[%c0_6, %c0_7] : memref<8x128xf32, #tpu.memory_space<vmem>>, vector<8x128xf32>
    tpu.vector_store %arg7[%c0_6, %c0_7], %7 {strides = array<i32>} : memref<8x128xf32, #tpu.memory_space<vmem>>, vector<8x128xf32>,
    %c0_i32_8 = arith.constant 0 : i32
    %9 = arith.cmpi eq, %arg2, %c0_i32_8 : i32
    %10 = arith.extui %9 : i1 to i32
    %c0_i32_9 = arith.constant 0 : i32
    %11 = arith.cmpi ne, %10, %c0_i32_9 : i32
    scf.if %11 {
      %c0_10 = arith.constant 0 : index
      %c0_11 = arith.constant 0 : index
      %12 = vector.load %arg7[%c0_10, %c0_11] : memref<8x128xf32, #tpu.memory_space<vmem>>, vector<8x128xf32>
      %cst_12 = arith.constant 0.00176776689 : f32
      %13 = vector.broadcast %cst_12 : f32 to vector<8x128xf32>
      %14 = arith.mulf %12, %13 : vector<8x128xf32>
      %c0_13 = arith.constant 0 : index
      %c0_14 = arith.constant 0 : index
      %15 = vector.load %arg5[%c0_13, %c0_14] : memref<1x128xf32, #tpu.memory_space<vmem>>, vector<1x128xf32>
      %cst_15 = arith.constant 0.00999999977 : f32
      %16 = vector.broadcast %cst_15 : f32 to vector<1x128xf32>
      %17 = arith.mulf %15, %16 : vector<1x128xf32>
      %18 = vector.broadcast %17 : vector<1x128xf32> to vector<8x128xf32>
      %19 = arith.addf %14, %18 : vector<8x128xf32>
      %cst_16 = arith.constant 0.000000e+00 : f32
      %20 = vector.broadcast %cst_16 : f32 to vector<8x128xf32>
      %21 = arith.cmpf oge, %19, %20 : vector<8x128xf32>
      %cst_17 = arith.constant 2.000000e-01 : f32
      %22 = vector.broadcast %cst_17 : f32 to vector<8x128xf32>
      %23 = arith.mulf %22, %19 : vector<8x128xf32>
      %24 = arith.select %21, %19, %23 : vector<8x128xi1>, vector<8x128xf32>
      %cst_18 = arith.constant 1.41421354 : f32
      %25 = vector.broadcast %cst_18 : f32 to vector<8x128xf32>
      %26 = arith.mulf %24, %25 : vector<8x128xf32>
      %c0_19 = arith.constant 0 : index
      %c0_20 = arith.constant 0 : index
      %27 = vector.load %arg6[%c0_19, %c0_20] : memref<8x128xf32, #tpu.memory_space<vmem>>, vector<8x128xf32>
      tpu.vector_store %arg6[%c0_19, %c0_20], %26 {strides = array<i32>} : memref<8x128xf32, #tpu.memory_space<vmem>>, vector<8x128xf32>,
    } else {
    }
    return
  }
  func.func @transform_0(%arg0: i32, %arg1: i32, %arg2: i32) -> (i32, i32) {
    %c0_i32 = arith.constant 0 : i32
    return %arg0, %arg2 : i32, i32
  }
  func.func @transform_1(%arg0: i32, %arg1: i32, %arg2: i32) -> (i32, i32) {
    %c0_i32 = arith.constant 0 : i32
    return %arg2, %arg1 : i32, i32
  }
  func.func @transform_2(%arg0: i32, %arg1: i32, %arg2: i32) -> (i32, i32) {
    %c0_i32 = arith.constant 0 : i32
    %c0_i32_0 = arith.constant 0 : i32
    return %c0_i32, %arg1 : i32, i32
  }
  func.func @transform_3(%arg0: i32, %arg1: i32, %arg2: i32) -> (i32, i32) {
    %c0_i32 = arith.constant 0 : i32
    return %arg0, %arg1 : i32, i32
  }
}

</mosaic_0001>

<bundles_post_ra>
// kernel: tpu_custom_call.1
= control target key start
LH: loop header
LB: loop body
LE: loop exit
PB: predicated region body
PF: predicated region fallthrough
CT: control target
= control target key end

     0   :  { %8 = vsyncpa [#allocation4], 0  ;;  %s401_s0 = inlined_call_operand.hbm [shape: f32[8,128], index: 0, kind: input, shape index: {}]   ;;  %s402_s1 = inlined_call_operand.hbm [shape: f32[128,128], index: 1, kind: input, shape index: {}]   ;;  %s403_s2 = inlined_call_operand.vmem [shape: f32[1,128], index: 2, kind: input, shape index: {}]   ;;  %s404_s3 = inlined_call_operand.hbm [shape: f32[8,128], index: 3, kind: output, shape index: {}]  }
   0x1   :  { %9 = vsyncpa [#allocation7], 0 }
   0x2   :  { %10 = vsyncpa [#allocation5], 0  ;;  %s327_s12 = smov [#allocation3]   ;;  %s328_s14 = smov [#allocation6]  }
   0x3   :  { %s17_s13 = sshll.u32 %s327_s12, 4  ;;  %s26_s15 = sshll.u32 %s328_s14, 4  ;;  %s18_s13 = int_to_ptr.vmem [resolvable:$true] %s17_s13  ;;  %s355_s15 = int_to_ptr.vmem [resolvable:$true] %s26_s15 }
   0x4   :  { %s255_s18 = scalar_lea.hbm %s401_s0, 128 }
   0x5   :  { %p256_p0 = scmp.ne.s32.totalorder %s401_s0, %s255_s18  ;;  %p259_p1 = scmp.lt.u32.totalorder %s255_s18, %s401_s0 }
   0x7   :  { %p261_p2 = pnand %p259_p1, %p256_p0 }
   0x9   :  { %264 = shalt.err (!%p261_p2)
}
   0xa   :  { %s265_s23 = scalar_lea.vmem %s18_s13, 128  ;;  %p270_p4 = scmp.lt.s32.totalorder %s18_s13, %s18_s13 }
   0xb   :  { %p266_p3 = scmp.ne.s32.totalorder %s18_s13, %s265_s23  ;;  %p271_p5 = scmp.lt.s32.totalorder %s265_s23, %s265_s23 }
   0xd   :  { %p272_p6 = por %p271_p5, %p270_p4 }
   0xf   :  { %p273_p7 = pnand %p272_p6, %p266_p3 }
  0x11   :  { %276 = shalt.err (!%p273_p7)
}
  0x12   :  { %20 = dma.hbm_to_vmem [thread:$0]  %s401_s0, 128, %s18_s13, [#allocation4]  }
  0x13   :  { %s277_s28 = scalar_lea.hbm %s402_s1, 2048 }
  0x14   :  { %p278_p8 = scmp.ne.s32.totalorder %s402_s1, %s277_s28  ;;  %p281_p9 = scmp.lt.u32.totalorder %s277_s28, %s402_s1 }
  0x16   :  { %p283_p10 = pnand %p281_p9, %p278_p8 }
  0x18   :  { %286 = shalt.err (!%p283_p10)
}
  0x19   :  { %s287_s6 = scalar_lea.vmem %s355_s15, 2048  ;;  %p292_p12 = scmp.lt.s32.totalorder %s355_s15, %s355_s15 }
  0x1a   :  { %p288_p11 = scmp.ne.s32.totalorder %s355_s15, %s287_s6  ;;  %p293_p13 = scmp.lt.s32.totalorder %s287_s6, %s287_s6 }
  0x1c   :  { %p294_p0 = por %p293_p13, %p292_p12 }
  0x1e   :  { %p295_p1 = pnand %p294_p0, %p288_p11 }
  0x20   :  { %298 = shalt.err (!%p295_p1)
}
  0x21   :  { %s329_s0 = smov 128   ;;  %s330_s7 = smov 8  }
  0x22   :  { %32 = dma.hbm_to_vmem [thread:$0]  %s402_s1, 2048, %s355_s15, [#allocation7], %s329_s0, %s329_s0, %s330_s7  }
  0x23   :  { %321 = dma.done.wait [#allocation4], 128  }
  0x24   :  { %322 = vsyncadd [#allocation4], 4294967168 }
  0x25   :  { %323 = dma.done.wait [#allocation7], 2048  }
  0x26   :  { %324 = vsyncadd [#allocation7], 4294965248  ;;  %v331_v0 = vmov 0.0|0.0   ;;  %vm332_vm0 = vmmov 0   ;;  %v333_v1 = vmov 0.0   ;;  %v48_v2 = vld [vmem:[#allocation6] sm:$0xff]  ;;  %v144_v27 = vlaneseq }
  0x27   :  { %223 = vmatprep.subr.bf16.mxu0 %v331_v0  ;;  %220 = vmatprep.mubr.msk.f32.mxu0 %vm332_vm0, %v333_v1  ;;  %v49_v3 = vld [vmem:[#allocation6 + $0x8] sm:$0xff]  ;;  %v50_v4 = vld [vmem:[#allocation6 + $0x10] sm:$0xff]  ;;  %v51_v6 = vld [vmem:[#allocation6 + $0x18] sm:$0xff]  ;;  %s334_s11 = smov [#allocation8]  }
  0x28   :  { %v224_v5 = vpack.c.bf16 %v49_v3, %v48_v2  ;;  %v227_v7 = vpack.c.bf16 %v51_v6, %v50_v4  ;;  %v52_v8 = vld [vmem:[#allocation6 + $0x20] sm:$0xff]  ;;  %v53_v9 = vld [vmem:[#allocation6 + $0x28] sm:$0xff]  ;;  %v54_v11 = vld [vmem:[#allocation6 + $0x30] sm:$0xff]  ;;  %v145_v28 = vshrl.u32 %v144_v27, 7  ;;  %s161_s12 = sshll.u32 %s334_s11, 4  ;;  %s162_s12 = int_to_ptr.vmem [resolvable:$true] %s161_s12 }
  0x29   :  { %v230_v10 = vpack.c.bf16 %v53_v9, %v52_v8  ;;  %v55_v12 = vld [vmem:[#allocation6 + $0x38] sm:$0xff]  ;;  %v56_v14 = vld [vmem:[#allocation6 + $0x40] sm:$0xff]  ;;  %v57_v15 = vld [vmem:[#allocation6 + $0x48] sm:$0xff]  ;;  %s299_s13 = scalar_lea.vmem %s162_s12, 128  ;;  %p304_p3 = scmp.lt.s32.totalorder %s162_s12, %s162_s12 }
  0x2a   :  { %225 = vmatpush3.bf16.msra.mxu0 %v224_v5  ;;  %v233_v13 = vpack.c.bf16 %v55_v12, %v54_v11  ;;  %v236_v16 = vpack.c.bf16 %v57_v15, %v56_v14  ;;  %v58_v17 = vld [vmem:[#allocation6 + $0x50] sm:$0xff]  ;;  %v59_v18 = vld [vmem:[#allocation6 + $0x58] sm:$0xff]  ;;  %v60_v20 = vld [vmem:[#allocation6 + $0x60] sm:$0xff]  ;;  %v146_v31 = vsub.s32 0, %v145_v28  ;;  %p300_p2 = scmp.ne.s32.totalorder %s162_s12, %s299_s13  ;;  %p305_p4 = scmp.lt.s32.totalorder %s299_s13, %s299_s13 }
  0x2b   :  { %226 = vmatprep.subr.bf16.mxu0 %v331_v0  ;;  %v239_v19 = vpack.c.bf16 %v59_v18, %v58_v17  ;;  %v61_v21 = vld [vmem:[#allocation6 + $0x68] sm:$0xff]  ;;  %v62_v23 = vld [vmem:[#allocation6 + $0x70] sm:$0xff]  ;;  %v63_v24 = vld [vmem:[#allocation6 + $0x78] sm:$0xff] }
  0x2c   :  { %v242_v22 = vpack.c.bf16 %v61_v21, %v60_v20  ;;  %v245_v25 = vpack.c.bf16 %v63_v24, %v62_v23  ;;  %v47_v26 = vld [vmem:[#allocation3] sm:$0xff]  ;;  %p306_p5 = por %p305_p4, %p304_p3 }
  0x2d   :  { %v141_v29 = vld [vmem:[%s403_s2] sm:$0x1] }
  0x2e   :  { %228 = vmatpush3.bf16.msra.mxu0 %v227_v7  ;;  %v142_v30 = vmul.f32 0.01, %v141_v29  ;;  %p307_p6 = pnand %p306_p5, %p300_p2 }
  0x2f   :  { %229 = vmatprep.subr.bf16.mxu0 %v331_v0 }
  0x30   :  { %v147_v32 = vrot.slane %v142_v30, %v146_v31 }
  0x32   :  { %231 = vmatpush3.bf16.msra.mxu0 %v230_v10 }
  0x33   :  { %232 = vmatprep.subr.bf16.mxu0 %v331_v0 }
  0x36   :  { %234 = vmatpush3.bf16.msra.mxu0 %v233_v13 }
  0x37   :  { %235 = vmatprep.subr.bf16.mxu0 %v331_v0 }
  0x3a   :  { %237 = vmatpush3.bf16.msra.mxu0 %v236_v16 }
  0x3b   :  { %238 = vmatprep.subr.bf16.mxu0 %v331_v0 }
  0x3e   :  { %240 = vmatpush3.bf16.msra.mxu0 %v239_v19 }
  0x3f   :  { %241 = vmatprep.subr.bf16.mxu0 %v331_v0 }
  0x42   :  { %243 = vmatpush3.bf16.msra.mxu0 %v242_v22 }
  0x43   :  { %244 = vmatprep.subr.bf16.mxu0 %v331_v0 }
  0x46   :  { %246 = vmatpush3.bf16.msra.mxu0 %v245_v25 }
  0x49   :  { %221 = vmatmul.mubr.f32.vlgmr.msra.gmra.mrb[0].mxu0 %v47_v26 }
 0x11c   :  { %v130_v33 = vpop.f32.mrb[0].mxu0 }
 0x11d   :  { %v140_v34 = vmul.f32 0.0017677669, %v130_v33  ;;  %v222_v35 = vpop.f32.mrb[1].mxu0 }
 0x11f   :  { %v149_v36 = vadd.f32 %v147_v32, %v140_v34 }
 0x121   :  { %v151_v37 = vmul.f32 0.2, %v149_v36  ;;  %vm150_vm1 = vcmp.ge.f32.partialorder %v149_v36, 0.0 }
 0x123   :  { %v152_v38 = vsel %vm150_vm1, %v149_v36, %v151_v37 }
 0x124   :  { %v153_v39 = vmul.f32 1.4142135, %v152_v38 }
 0x126   :  { %154 = vst [vmem:[#allocation8] sm:$0xff] %v153_v39 }
 0x127   :  { %310 = shalt.err (!%p307_p6)
}
 0x128   :  { %s311_s15 = scalar_lea.hbm %s404_s3, 128 }
 0x129   :  { %p312_p7 = scmp.ne.s32.totalorder %s404_s3, %s311_s15  ;;  %p315_p8 = scmp.lt.u32.totalorder %s311_s15, %s404_s3 }
 0x12b   :  { %p317_p9 = pnand %p315_p8, %p312_p7 }
 0x12d   :  { %320 = shalt.err (!%p317_p9)
}
 0x12e   :  { %164 = dma.vmem_to_hbm [thread:$0]  %s162_s12, 128, %s404_s3, [#allocation5]  }
 0x12f   :  { %325 = dma.done.wait [#allocation5], 128  }
 0x130   :  { %326 = vsyncadd [#allocation5], 4294967168 }
 0x131   :  { %168 = vsyncpa [#allocation4], 1 }
 0x132   :  { %169 = vsyncpa [#allocation7], 1 }
 0x133   :  { %170 = vsyncpa [#allocation5], 1 }

</bundles_post_ra>
